<compile_context>
chip_gen: v5e
topology: v5e:2x2
jax: 0.10.0
libtpu: 0.0.40
codegen_flags: <defaults>
</compile_context>

<pallas_src>
import math

import jax
import jax.numpy as jnp
from jax.experimental import pallas as pl
from jax.experimental.pallas import tpu as pltpu

_LANE = 128          # vreg lane width (last dim)
_SUBLANE_BF16 = 16   # bf16 packs 16 rows per vreg (min second-to-last tile)


def _round_up(v, m):
    return (v + m - 1) // m * m


def _linear_kernel(x_ref, wt_ref, b_ref, o_ref):
    """One (tm, tn) output tile, single shot: bf16 operands -> f32 MXU
    accumulation -> one f32 bias add -> lane-dense store.  No k axis, no
    scratch accumulator, no pl.when phases."""
    acc = jnp.dot(x_ref[...], wt_ref[...], preferred_element_type=jnp.float32)
    o_ref[...] = (acc + b_ref[...]).astype(o_ref.dtype)


def _plan_tiles(M, K_pad, N_pad):
    """Choose (tm, tn, M_pad, plan_bytes) for a 2-D (parallel, parallel) grid.

    - tm is a multiple of 16 (bf16 x operand packing); tn is a multiple of 128
      that divides N_pad.
    - The weight panel (K_pad, tn) stays VMEM-resident; with a single j-block
      (common WaveNet-layer case) it is DMA'd from HBM exactly once.
    - Aim for >= 2 parallel blocks so both v7x TensorCores get work.
    - Keep the double-buffered working set under ~24 MiB so the plan fits
      every generation (v7x: 64 MiB physical / 32 MiB scoped default).
    """
    budget = 24 << 20

    m16 = _round_up(max(M, 1), _SUBLANE_BF16)
    if m16 <= 512:
        # Split M into two i-blocks (both v7x cores) when it costs no padding.
        tm = m16 // 2 if (m16 >= 32 and m16 % 32 == 0) else m16
    else:
        tm = 64
        for cand in (512, 256, 128, 64):
            if _round_up(m16, cand) - m16 <= max(m16 // 16, _SUBLANE_BF16):
                tm = cand
                break

    q = N_pad // _LANE
    tn_candidates = sorted({_LANE * d for d in range(1, q + 1) if q % d == 0},
                           reverse=True)

    def plan_bytes(tm_, tn_):
        return (2 * tm_ * K_pad * 2 +    # x blocks       (bf16, double-buffered)
                2 * K_pad * tn_ * 2 +    # weight panel   (bf16)
                2 * tm_ * tn_ * 4 +      # output blocks  (f32)
                2 * tn_ * 4)             # bias           (f32)

    tn = tn_candidates[-1]               # smallest (=128) as a fallback
    for cand in tn_candidates:           # prefer the whole N resident per block
        if plan_bytes(tm, cand) <= budget:
            tn = cand
            break
    while plan_bytes(tm, tn) > budget and tm > _SUBLANE_BF16:
        tm = max(_SUBLANE_BF16, _round_up(tm // 2, _SUBLANE_BF16))

    M_pad = _round_up(m16, tm)

    # v7x megacore: if the grid collapsed to a single block, try splitting N.
    if (M_pad // tm) * (N_pad // tn) == 1:
        smaller = [c for c in tn_candidates if c < tn]
        if smaller:
            tn = smaller[0]

    return tm, tn, M_pad, plan_bytes(tm, tn)


def wavenet_layer_forward(x, params, y_true=None, epoch=None):
    """Pallas equivalent of WaveNetLayer.forward with use_backprop=True.

    x:      [B, in_dim] float32 (logical, unpadded)
    params: dict from init_wavenet_layer (holds bf16 pre-transposed padded
            weight, f32 padded bias, logical out_dim)
    y_true, epoch: accepted for signature parity; unused on this path.
    """
    del y_true, epoch
    w_t = params["w_t_padded"]        # [K_pad, N_pad] bf16, pre-transposed
    bias = params["bias_padded"]      # [1,    N_pad] f32
    out_dim = int(params["out_dim"])

    M, K = x.shape
    K_pad, N_pad = w_t.shape
    assert K <= K_pad and K_pad % _LANE == 0 and N_pad % _LANE == 0

    tm, tn, M_pad, plan_bytes = _plan_tiles(M, K_pad, N_pad)
    grid = (M_pad // tm, N_pad // tn)

    # Single fused pad+cast pass over x.  Zero-padding the K columns is
    # required for correctness (padded weight rows must never multiply
    # garbage: 0 * NaN = NaN).  No-op when the caller already supplies
    # aligned bf16 activations.
    if x.dtype != jnp.bfloat16 or (M, K) != (M_pad, K_pad):
        x = jnp.pad(x, ((0, M_pad - M), (0, K_pad - K))).astype(jnp.bfloat16)

    # Advisory cost estimate with the plan's actual fetch counts:
    #   x read once per i-block, weight once per grid step (once total when
    #   grid_j == 1, since its block index never changes), output written once.
    w_fetches = grid[0] * grid[1] if grid[1] > 1 else 1
    bytes_accessed = (M_pad * K_pad * 2
                      + w_fetches * K_pad * tn * 2
                      + M_pad * N_pad * 4
                      + w_fetches * tn * 4)
    flops = 2 * M_pad * K_pad * N_pad

    vmem_limit = int(min(max(plan_bytes * 2, 32 << 20), 48 << 20))

    out_padded = pl.pallas_call(
        _linear_kernel,
        out_shape=jax.ShapeDtypeStruct((M_pad, N_pad), jnp.float32),
        grid_spec=pltpu.PrefetchScalarGridSpec(
            num_scalar_prefetch=0,
            grid=grid,
            in_specs=[
                pl.BlockSpec((tm, K_pad), lambda i, j: (i, 0)),   # x row panel
                pl.BlockSpec((K_pad, tn), lambda i, j: (0, j)),   # weight panel
                pl.BlockSpec((1, tn), lambda i, j: (0, j)),       # bias slab
            ],
            out_specs=pl.BlockSpec((tm, tn), lambda i, j: (i, j)),
        ),
        compiler_params=pltpu.CompilerParams(
            dimension_semantics=("parallel", "parallel"),
            vmem_limit_bytes=vmem_limit,
        ),
        cost_estimate=pl.CostEstimate(
            flops=flops, transcendentals=0, bytes_accessed=bytes_accessed),
    )(x, w_t, bias)

    # Slice away the padding (pure XLA glue).
    return out_padded[:M, :out_dim]


def generate_class_prototypes(n_classes, dim, i=0.2, h=0.05):
    # Kept for module parity (buffer init); not used on the forward hot path.
    protos = []
    base = jnp.linspace(-1.0, 1.0, dim)
    for c in range(n_classes):
        shift = c / n_classes * math.pi
        protos.append(i * jnp.sin(math.pi * base * c * h + shift))
    return jnp.stack(protos)


def init_wavenet_layer(key, in_dim, out_dim, n_classes=32):
    """Deterministic init mirroring nn.Linear's default (uniform).

    The weight is stored pre-transposed, zero-padded to lane-dense shapes and
    cast to bf16 ONCE here, so every forward call feeds the MXU its native
    bf16 operands at half the HBM bytes with no per-call transpose/reshape.
    The bias stays f32 (added once on the f32 accumulator).
    """
    kw, kb = jax.random.split(key)
    bound = 1.0 / math.sqrt(in_dim)
    weight = jax.random.uniform(kw, (out_dim, in_dim), jnp.float32, -bound, bound)
    bias = jax.random.uniform(kb, (out_dim,), jnp.float32, -bound, bound)

    k_pad = _round_up(in_dim, _LANE)
    n_pad = _round_up(out_dim, _LANE)
    w_t_padded = (jnp.zeros((k_pad, n_pad), jnp.float32)
                  .at[:in_dim, :out_dim].set(weight.T)).astype(jnp.bfloat16)
    bias_padded = (jnp.zeros((1, n_pad), jnp.float32)
                   .at[0, :out_dim].set(bias))

    return dict(weight=weight, bias=bias, out_dim=out_dim,
                w_t_padded=w_t_padded, bias_padded=bias_padded,
                i=jnp.float32(0.1), h=jnp.float32(0.01),
                class_prototypes=generate_class_prototypes(n_classes, out_dim))


if __name__ == "__main__":
    # Small shapes consistent with the module: batch=8, in_dim=16, out_dim=32.
    B, IN_DIM, OUT_DIM, N_CLASSES = 8, 16, 32, 32

    root = jax.random.PRNGKey(0)
    k_x, k_y, k_params = jax.random.split(root, 3)

    x = jax.random.normal(k_x, (B, IN_DIM), dtype=jnp.float32)
    y_true = jax.random.randint(k_y, (B,), 0, N_CLASSES)

    params = init_wavenet_layer(k_params, IN_DIM, OUT_DIM, n_classes=N_CLASSES)

    out = wavenet_layer_forward(x, params, y_true=y_true, epoch=0)
    out = jax.block_until_ready(out)

    # Reference check against plain f32 JAX linear (PyTorch nn.Linear
    # semantics).  Tolerance sized for bf16 operands / f32 accumulation.
    ref = x @ params["weight"].T + params["bias"]
    assert out.shape == (B, OUT_DIM)
    assert out.dtype == jnp.float32
    assert jnp.allclose(out, ref, atol=2e-2, rtol=2e-2), float(
        jnp.max(jnp.abs(out - ref)))

    # TODO(synk): the use_backprop=False branch (stateful wave-error weight
    # updates, RNG parameter kicks, Python-side phase/emitter memory lists) is
    # host-side training logic, not a kernel hot path, and is not ported.

    print("KERNEL_OK")
</pallas_src>

<mosaic_0001>
module attributes {stable_mosaic.version = 11 : i64} {
  func.func @_linear_kernel(%arg0: i32, %arg1: i32, %arg2: memref<16x128xbf16, #tpu.memory_space<vmem>>, %arg3: memref<128x128xbf16, #tpu.memory_space<vmem>>, %arg4: memref<1x128xf32, #tpu.memory_space<vmem>>, %arg5: memref<16x128xf32, #tpu.memory_space<vmem>>) attributes {dimension_semantics = [#tpu.dimension_semantics<parallel>, #tpu.dimension_semantics<parallel>], iteration_bounds = array<i64: 1, 1>, scalar_prefetch = 0 : i64, scratch_operands = 0 : i64, tpu.core_type = #tpu.core_type<tc>, window_params = [{transform_indices = @transform_0, window_bounds = array<i64: 16, 128>}, {transform_indices = @transform_1, window_bounds = array<i64: 128, 128>}, {transform_indices = @transform_2, window_bounds = array<i64: 1, 128>}, {transform_indices = @transform_3, window_bounds = array<i64: 16, 128>}]} {
    %c0 = arith.constant 0 : index
    %c0_0 = arith.constant 0 : index
    %0 = vector.load %arg2[%c0, %c0_0] : memref<16x128xbf16, #tpu.memory_space<vmem>>, vector<16x128xbf16>
    %c0_1 = arith.constant 0 : index
    %c0_2 = arith.constant 0 : index
    %1 = vector.load %arg3[%c0_1, %c0_2] : memref<128x128xbf16, #tpu.memory_space<vmem>>, vector<128x128xbf16>
    %cst = arith.constant dense<0.000000e+00> : vector<16x128xf32>
    %2 = tpu.matmul %0, %1, %cst {dimension_numbers = #tpu.dot_dimension_numbers<[1], [0], [0], [1], [0, 0, 1, 1], [], []>} : vector<16x128xbf16>, vector<128x128xbf16>, vector<16x128xf32> -> vector<16x128xf32>
    %c0_3 = arith.constant 0 : index
    %c0_4 = arith.constant 0 : index
    %3 = vector.load %arg4[%c0_3, %c0_4] : memref<1x128xf32, #tpu.memory_space<vmem>>, vector<1x128xf32>
    %4 = vector.broadcast %3 : vector<1x128xf32> to vector<16x128xf32>
    %5 = arith.addf %2, %4 : vector<16x128xf32>
    %c0_5 = arith.constant 0 : index
    %c0_6 = arith.constant 0 : index
    %6 = vector.load %arg5[%c0_5, %c0_6] : memref<16x128xf32, #tpu.memory_space<vmem>>, vector<16x128xf32>
    tpu.vector_store %arg5[%c0_5, %c0_6], %5 {strides = array<i32>} : memref<16x128xf32, #tpu.memory_space<vmem>>, vector<16x128xf32>,
    return
  }
  func.func @transform_0(%arg0: i32, %arg1: i32) -> (i32, i32) {
    %c0_i32 = arith.constant 0 : i32
    %c0_i32_0 = arith.constant 0 : i32
    return %arg0, %c0_i32 : i32, i32
  }
  func.func @transform_1(%arg0: i32, %arg1: i32) -> (i32, i32) {
    %c0_i32 = arith.constant 0 : i32
    %c0_i32_0 = arith.constant 0 : i32
    return %c0_i32, %arg1 : i32, i32
  }
  func.func @transform_2(%arg0: i32, %arg1: i32) -> (i32, i32) {
    %c0_i32 = arith.constant 0 : i32
    %c0_i32_0 = arith.constant 0 : i32
    return %c0_i32, %arg1 : i32, i32
  }
  func.func @transform_3(%arg0: i32, %arg1: i32) -> (i32, i32) {
    %c0_i32 = arith.constant 0 : i32
    return %arg0, %arg1 : i32, i32
  }
}

</mosaic_0001>

<bundles_post_ra>
// kernel: tpu_custom_call.1
= control target key start
LH: loop header
LB: loop body
LE: loop exit
PB: predicated region body
PF: predicated region fallthrough
CT: control target
= control target key end

     0   :  { %8 = vsyncpa [#allocation3], 0  ;;  %s329_s0 = inlined_call_operand.hbm [shape: bf16[16,128], index: 0, kind: input, shape index: {}]   ;;  %s330_s1 = inlined_call_operand.hbm [shape: bf16[128,128], index: 1, kind: input, shape index: {}]   ;;  %s331_s2 = inlined_call_operand.vmem [shape: f32[1,128], index: 2, kind: input, shape index: {}]   ;;  %s332_s3 = inlined_call_operand.hbm [shape: f32[16,128], index: 3, kind: output, shape index: {}]  }
   0x1   :  { %9 = vsyncpa [#allocation6], 0 }
   0x2   :  { %10 = vsyncpa [#allocation4], 0  ;;  %s15_s14 = sshll.u32 %s329_s0, 4  ;;  %s290_s15 = smov [#allocation2]   ;;  %s16_s14 = int_to_ptr.hbm [resolvable:$true] %s15_s14 }
   0x3   :  { %s17_s16 = sshll.u32 %s290_s15, 4  ;;  %s28_s19 = sshll.u32 %s330_s1, 4  ;;  %s18_s16 = int_to_ptr.vmem [resolvable:$true] %s17_s16  ;;  %s29_s19 = int_to_ptr.hbm [resolvable:$true] %s28_s19 }
   0x4   :  { %s291_s20 = smov 64   ;;  %s292_s21 = smov 4  }
   0x5   :  { %23 = dma.hbm_to_vmem [thread:$0]  %s16_s14, 128, %s18_s16, [#allocation3], %s291_s20, %s291_s20, %s292_s21  }
   0x6   :  { %s293_s22 = smov [#allocation5]  }
   0x7   :  { %s30_s23 = sshll.u32 %s293_s22, 4  ;;  %s31_s23 = int_to_ptr.vmem [resolvable:$true] %s30_s23 }
   0x8   :  { %36 = dma.hbm_to_vmem [thread:$0]  %s29_s19, 1024, %s31_s23, [#allocation6], %s291_s20, %s291_s20, %s292_s21  }
   0x9   :  { %284 = dma.done.wait [#allocation3], 128  }
   0xa   :  { %285 = vsyncadd [#allocation3], 4294967168 }
   0xb   :  { %286 = dma.done.wait [#allocation6], 1024  }
   0xc   :  { %287 = vsyncadd [#allocation6], 4294966272  ;;  %v203_v0 = vld [vmem:[#allocation5 + $0x38] sm:$0xff]  ;;  %v202_v1 = vld [vmem:[#allocation5 + $0x30] sm:$0xff]  ;;  %s294_s24 = smov [#allocation7]   ;;  %s145_s28 = sshll.u32 %s332_s3, 4  ;;  %s146_s28 = int_to_ptr.hbm [resolvable:$true] %s145_s28 }
   0xd   :  { %123 = vmatpush.bf16.msra.mxu0 %v203_v0  ;;  %v201_v2 = vld [vmem:[#allocation5 + $0x28] sm:$0xff]  ;;  %v200_v3 = vld [vmem:[#allocation5 + $0x20] sm:$0xff]  ;;  %v199_v4 = vld [vmem:[#allocation5 + $0x18] sm:$0xff]  ;;  %s143_s25 = sshll.u32 %s294_s24, 4  ;;  %s295_s29 = smov 128   ;;  %s144_s25 = int_to_ptr.vmem [resolvable:$true] %s143_s25 }
   0xe   :  { %v198_v5 = vld [vmem:[#allocation5 + $0x10] sm:$0xff]  ;;  %v197_v6 = vld [vmem:[#allocation5 + $0x8] sm:$0xff]  ;;  %v196_v7 = vld [vmem:[#allocation5] sm:$0xff]  ;;  %s296_s30 = smov 8  }
   0xf   :  { %v195_v8 = vld [vmem:[#allocation2] sm:$0xff] }
  0x10   :  { %v211_v9 = vld [vmem:[%s331_s2] ss:$0 sm:$0xff] }
  0x11   :  { %124 = vmatpush.bf16.msra.mxu0 %v202_v1 }
  0x15   :  { %125 = vmatpush.bf16.msra.mxu0 %v201_v2 }
  0x19   :  { %126 = vmatpush.bf16.msra.mxu0 %v200_v3 }
  0x1d   :  { %127 = vmatpush.bf16.msra.mxu0 %v199_v4 }
  0x21   :  { %128 = vmatpush.bf16.msra.mxu0 %v198_v5 }
  0x25   :  { %129 = vmatpush.bf16.msra.mxu0 %v197_v6 }
  0x29   :  { %130 = vmatpush.bf16.msra.mxu0 %v196_v7 }
  0x2c   :  { %131 = vmatmul.bf16.vlgmr.msra.gmra.mxu0 %v195_v8 }
  0xa9   :  { %v132_v10 = vpop.f32.mrf.mxu0 }
  0xaa   :  { %v133_v11 = vadd.f32 %v211_v9, %v132_v10 }
  0xac   :  { %137 = vst [vmem:[#allocation7] sm:$0xff] %v133_v11 }
  0xb1   :  { %v134_v12 = vpop.f32.mrf.mxu0 }
  0xb2   :  { %v135_v13 = vadd.f32 %v211_v9, %v134_v12 }
  0xb4   :  { %138 = vst [vmem:[#allocation7 + $0x8] sm:$0xff] %v135_v13 }
  0xb5   :  { %151 = dma.vmem_to_hbm [thread:$0]  %s144_s25, 256, %s146_s28, [#allocation4], %s295_s29, %s295_s29, %s296_s30  }
  0xb6   :  { %288 = dma.done.wait [#allocation4], 256  }
  0xb7   :  { %289 = vsyncadd [#allocation4], 4294967040 }
  0xb8   :  { %156 = vsyncpa [#allocation3], 1 }
  0xb9   :  { %157 = vsyncpa [#allocation6], 1 }
  0xba   :  { %158 = vsyncpa [#allocation4], 1 }

</bundles_post_ra>
